<compile_context>
chip_gen: v6e
topology: v6e:2x2x1
jax: 0.10.0
libtpu: 0.0.40
codegen_flags: <defaults>
</compile_context>

<pallas_src>
import math
import jax
import jax.numpy as jnp
from jax.experimental import pallas as pl
from jax.experimental.pallas import tpu as pltpu

# ----------------------- small synthetic CLIP config -----------------------
B = 2
IMG_C, IMG_H, IMG_W = 3, 16, 16
PATCH = 4
N_PATCH = (IMG_H // PATCH) * (IMG_W // PATCH)      # 16
PATCH_DIM = IMG_C * PATCH * PATCH                  # 48
IMAGE_EMBED = 64                                   # CFG.image_embedding (small)
TEXT_EMBED = 32                                    # CFG.text_embedding (small)
SEQ = 8
VOCAB = 100
FFN_DIM = 4 * TEXT_EMBED                           # 128
PROJ_DIM = 32                                      # CFG.projection_dim (small)
LN_EPS = 1e-5                                      # torch.nn.LayerNorm default
TEMPERATURE = 1.0                                  # stored but unused in forward
OUT_W = 128                                        # lane width of every slab

# ------------ grid split (v7x has 2 TensorCores; harmless on v5e/v6e) ------------
NSPLIT = 2
assert B % NSPLIT == 0
BH = B // NSPLIT                                   # batch rows per grid step

# ------------ activation slab layout (per grid step), all 128 lanes wide ---------
R_POOL = 0                                         # rows [0,8): pooled patches (BH valid)
R_TOK = 8                                          # rows [8, 8+BH*SEQ): token embeddings
R_MSK = R_TOK + BH * SEQ                           # one row: attention mask (BH*SEQ lanes)
A_ROWS = R_MSK + 8                                 # pad to a sublane granule
assert BH <= 8

# ------------ weight slab row offsets (each K a multiple of 8) --------------------
W_PATCH = 0                                        # (48, :64)   patch embedding
W_QKV = W_PATCH + PATCH_DIM                        # (32, :96)   [Wq|Wk|Wv]
W_O = W_QKV + TEXT_EMBED                           # (32, :32)   attention out proj
W_F1 = W_O + TEXT_EMBED                            # (32, :128)  FFN up
W_F2 = W_F1 + TEXT_EMBED                           # (128,:32)   FFN down
W_P1 = W_F2 + FFN_DIM                              # (128,128)   fused proj W1 (block-diag)
W_P2 = W_P1 + OUT_W                                # (128,128)   fused proj W2 (block-diag)
W_ROWS = W_P2 + OUT_W                              # 528

# ------------ bias / LayerNorm-parameter slab rows --------------------------------
V_IMG_B = 0
V_BQKV = 1
V_BO, V_LN1_G, V_LN1_B = 2, 3, 4
V_CF1, V_CF2, V_LN2_G, V_LN2_B = 5, 6, 7, 8
V_PB1, V_PB2, V_PG, V_PBE = 9, 10, 11, 12          # fused-proj [img | txt] rows
V_ROWS = 16


# ------------------------------ kernel helpers ------------------------------
def _gelu(x):
    # TODO(synk): PyTorch nn.GELU default is erf-based; tanh approximation is
    # used here for guaranteed Mosaic lowering (difference ~1e-3).
    return 0.5 * x * (1.0 + jnp.tanh(0.7978845608028654 * (x + 0.044715 * x * x * x)))


def _layernorm(x, g, b):
    mu = jnp.mean(x, axis=-1, keepdims=True)
    var = jnp.mean((x - mu) ** 2, axis=-1, keepdims=True)
    return (x - mu) * jax.lax.rsqrt(var + LN_EPS) * g + b


# ------------------------------ fused Pallas kernel ------------------------------
def _clip_fused_kernel(act_ref, w_ref, vec_ref, out_ref):
    D = TEXT_EMBED
    vecs = vec_ref[...]                                              # (V_ROWS, 128)

    def vrow(r, n=OUT_W):
        return vecs[r:r + 1, 0:n]

    # ---- image branch: mean-pooled patches -> patch embedding (one MXU push) ----
    pooled = act_ref[R_POOL:R_POOL + BH, 0:PATCH_DIM]                # (BH, 48)
    feat = jnp.dot(pooled, w_ref[W_PATCH:W_PATCH + PATCH_DIM, :],
                   preferred_element_type=jnp.float32) + vrow(V_IMG_B)   # (BH,128), lanes 64:=0

    # ---- text branch: single-layer, single-head self-attention, CLS query only ----
    x_all = act_ref[R_TOK:R_TOK + BH * SEQ, 0:D]                     # (BH*SEQ, 32)
    qkv = jnp.dot(x_all, w_ref[W_QKV:W_QKV + D, 0:3 * D],
                  preferred_element_type=jnp.float32) + vrow(V_BQKV, 3 * D)   # (BH*SEQ, 96)
    k = qkv[:, D:2 * D]
    v = qkv[:, 2 * D:3 * D]
    # Only token 0 (target_token_idx) of each sequence feeds the rest of the network.
    # (Valid because the stand-in encoder is a single layer.)
    q_cls = qkv.reshape(BH, SEQ, 3 * D)[:, 0, 0:D]                   # (BH, 32)
    x_cls = x_all.reshape(BH, SEQ, D)[:, 0, :]                       # (BH, 32)

    # additive attention bias built in-kernel: 0 for same-sequence & unmasked keys.
    kcol = jax.lax.broadcasted_iota(jnp.int32, (BH, BH * SEQ), 1)
    qrow = jax.lax.broadcasted_iota(jnp.int32, (BH, BH * SEQ), 0)
    same_seq = jnp.logical_and(kcol >= qrow * SEQ, kcol < (qrow + 1) * SEQ)
    key_ok = act_ref[R_MSK:R_MSK + 1, 0:BH * SEQ] > 0.0              # (1, BH*SEQ)
    bias = jnp.where(jnp.logical_and(same_seq, key_ok), 0.0, -1e30)

    scores = jax.lax.dot_general(q_cls, k, (((1,), (1,)), ((), ())),
                                 preferred_element_type=jnp.float32)  # (BH, BH*SEQ)
    scores = scores * (1.0 / math.sqrt(D)) + bias
    m = jnp.max(scores, axis=-1, keepdims=True)
    p = jnp.exp(scores - m)
    p = p / jnp.sum(p, axis=-1, keepdims=True)
    attn = jnp.dot(p, v, preferred_element_type=jnp.float32)          # (BH, 32)
    ao = jnp.dot(attn, w_ref[W_O:W_O + D, 0:D],
                 preferred_element_type=jnp.float32) + vrow(V_BO, D)
    x1 = _layernorm(x_cls + ao, vrow(V_LN1_G, D), vrow(V_LN1_B, D))   # (BH, 32)

    f = _gelu(jnp.dot(x1, w_ref[W_F1:W_F1 + D, 0:FFN_DIM],
                      preferred_element_type=jnp.float32) + vrow(V_CF1, FFN_DIM))
    f = jnp.dot(f, w_ref[W_F2:W_F2 + FFN_DIM, 0:D],
                preferred_element_type=jnp.float32) + vrow(V_CF2, D)
    x2 = _layernorm(x1 + f, vrow(V_LN2_G, D), vrow(V_LN2_B, D))       # (BH, 32)

    # ---- fused image/text projection heads (block-diagonal weights) ----
    # LHS rows [0,BH) = image (features at lanes 0:64), rows [BH,2BH) = text (lanes 64:96).
    txt_lhs = jnp.concatenate(
        [jnp.zeros((BH, IMAGE_EMBED), jnp.float32), x2,
         jnp.zeros((BH, OUT_W - IMAGE_EMBED - D), jnp.float32)], axis=-1)     # (BH, 128)
    lhs = jnp.concatenate([feat, txt_lhs], axis=0)                             # (2BH, 128)

    h = jnp.dot(lhs, w_ref[W_P1:W_P1 + OUT_W, :],
                preferred_element_type=jnp.float32)        # image -> lanes 0:32, text -> 32:64
    h = _gelu(h + vrow(V_PB1))
    h = jnp.dot(h, w_ref[W_P2:W_P2 + OUT_W, :],
                preferred_element_type=jnp.float32) + vrow(V_PB2)              # (2BH, 128)

    # segment-masked LayerNorm: image rows normalize lanes [0,32), text rows [32,64).
    lane = jax.lax.broadcasted_iota(jnp.int32, (2 * BH, OUT_W), 1)
    rowi = jax.lax.broadcasted_iota(jnp.int32, (2 * BH, OUT_W), 0)
    is_img = rowi < BH
    valid = jnp.logical_or(
        jnp.logical_and(is_img, lane < PROJ_DIM),
        jnp.logical_and(jnp.logical_not(is_img),
                        jnp.logical_and(lane >= PROJ_DIM, lane < 2 * PROJ_DIM)))
    hv = jnp.where(valid, h, 0.0)
    mu = jnp.sum(hv, axis=-1, keepdims=True) * (1.0 / PROJ_DIM)
    cen = jnp.where(valid, h - mu, 0.0)
    var = jnp.sum(cen * cen, axis=-1, keepdims=True) * (1.0 / PROJ_DIM)
    out_ref[...] = cen * jax.lax.rsqrt(var + LN_EPS) * vrow(V_PG) + vrow(V_PBE)


# ------------------------------ wrappers (glue) ------------------------------
def _pack_params(params):
    txt = params["txt"]
    ip = params["img_proj"]
    tp = params["txt_proj"]

    def padw(w):
        w = w.astype(jnp.float32)
        return jnp.pad(w, ((0, 0), (0, OUT_W - w.shape[1])))

    wqkv = jnp.concatenate([txt["wq"], txt["wk"], txt["wv"]], axis=-1)        # (32, 96)

    # fused projection-head weights: block-diagonal (image -> lanes 0:32, text -> 32:64)
    wp1 = jnp.zeros((OUT_W, OUT_W), jnp.float32)
    wp1 = wp1.at[:IMAGE_EMBED, :PROJ_DIM].set(ip["w1"])
    wp1 = wp1.at[IMAGE_EMBED:IMAGE_EMBED + TEXT_EMBED, PROJ_DIM:2 * PROJ_DIM].set(tp["w1"])
    wp2 = jnp.zeros((OUT_W, OUT_W), jnp.float32)
    wp2 = wp2.at[:PROJ_DIM, :PROJ_DIM].set(ip["w2"])
    wp2 = wp2.at[PROJ_DIM:2 * PROJ_DIM, PROJ_DIM:2 * PROJ_DIM].set(tp["w2"])

    w_slab = jnp.concatenate([
        padw(params["img_w"]),          # rows [0, 48)
        padw(wqkv),                     # rows [48, 80)
        padw(txt["wo"]),                # rows [80, 112)
        padw(txt["wf1"]),               # rows [112, 144)
        padw(txt["wf2"]),               # rows [144, 272)
        wp1,                            # rows [272, 400)
        wp2,                            # rows [400, 528)
    ], axis=0)

    def row(v):
        v = v.reshape(-1).astype(jnp.float32)
        return jnp.pad(v, (0, OUT_W - v.shape[0]))

    vec_rows = [
        row(params["img_b"]),                                                 # V_IMG_B
        row(jnp.concatenate([txt["bq"], txt["bk"], txt["bv"]], axis=-1)),     # V_BQKV
        row(txt["bo"]), row(txt["ln1_g"]), row(txt["ln1_b"]),                 # V_BO, V_LN1_*
        row(txt["cf1"]), row(txt["cf2"]), row(txt["ln2_g"]), row(txt["ln2_b"]),
        row(jnp.concatenate([ip["b1"], tp["b1"]], axis=-1)),                  # V_PB1
        row(jnp.concatenate([ip["b2"], tp["b2"]], axis=-1)),                  # V_PB2
        row(jnp.concatenate([ip["g"], tp["g"]], axis=-1)),                    # V_PG
        row(jnp.concatenate([ip["be"], tp["be"]], axis=-1)),                  # V_PBE
    ]
    while len(vec_rows) < V_ROWS:
        vec_rows.append(jnp.zeros((OUT_W,), jnp.float32))
    vec_slab = jnp.stack(vec_rows, axis=0)                                    # (16, 128)
    return w_slab, vec_slab


def clip_forward(params, img, cap_idx, atten_msk):
    assert img.shape[0] == B

    # NCHW -> patches (stride=PATCH "conv"), mean-pooled over patches in the wrapper:
    # pooling commutes with the affine patch embedding, so only (B, PATCH_DIM) enters
    # the kernel (16x smaller DMA, one MXU push instead of two).
    p = img.reshape(B, IMG_C, IMG_H // PATCH, PATCH, IMG_W // PATCH, PATCH)
    p = p.transpose(0, 2, 4, 1, 3, 5).reshape(B, N_PATCH, PATCH_DIM)
    pooled = jnp.mean(p, axis=1)                                              # (B, 48)

    txt = params["txt"]
    x_tok = txt["tok_emb"][cap_idx] + txt["pos_emb"][None, :, :]              # (B, SEQ, 32)

    # single lane-dense activation slab, split into NSPLIT contiguous batch halves
    act = jnp.zeros((NSPLIT, A_ROWS, OUT_W), jnp.float32)
    act = act.at[:, R_POOL:R_POOL + BH, :PATCH_DIM].set(
        pooled.reshape(NSPLIT, BH, PATCH_DIM))
    act = act.at[:, R_TOK:R_TOK + BH * SEQ, :TEXT_EMBED].set(
        x_tok.reshape(NSPLIT, BH * SEQ, TEXT_EMBED))
    act = act.at[:, R_MSK, :BH * SEQ].set(
        atten_msk.astype(jnp.float32).reshape(NSPLIT, BH * SEQ))

    w_slab, vec_slab = _pack_params(params)

    out = pl.pallas_call(
        _clip_fused_kernel,
        out_shape=jax.ShapeDtypeStruct((NSPLIT, 2 * BH, OUT_W), jnp.float32),
        grid=(NSPLIT,),
        in_specs=[
            pl.BlockSpec((None, A_ROWS, OUT_W), lambda h: (h, 0, 0)),
            pl.BlockSpec((W_ROWS, OUT_W), lambda h: (0, 0)),   # weights resident across steps
            pl.BlockSpec((V_ROWS, OUT_W), lambda h: (0, 0)),
        ],
        out_specs=pl.BlockSpec((None, 2 * BH, OUT_W), lambda h: (h, 0, 0)),
        compiler_params=pltpu.CompilerParams(dimension_semantics=("parallel",)),
    )(act, w_slab, vec_slab)

    image_embeddings = out[:, :BH, :PROJ_DIM].reshape(B, PROJ_DIM)
    text_embeddings = out[:, BH:, PROJ_DIM:2 * PROJ_DIM].reshape(B, PROJ_DIM)
    return image_embeddings, text_embeddings


# --------------------------- pure-JAX reference (for checking) ---------------------------
def _reference_forward(params, img, cap_idx, atten_msk):
    txt = params["txt"]
    ip = params["img_proj"]
    tp = params["txt_proj"]

    # image encoder stand-in: per-patch embedding then mean pool (original order)
    p = img.reshape(B, IMG_C, IMG_H // PATCH, PATCH, IMG_W // PATCH, PATCH)
    p = p.transpose(0, 2, 4, 1, 3, 5).reshape(B, N_PATCH, PATCH_DIM)
    feat = jnp.mean(p @ params["img_w"] + params["img_b"], axis=1)            # (B, 64)

    def proj(x, pp):
        h = _gelu(x @ pp["w1"] + pp["b1"])
        h = h @ pp["w2"] + pp["b2"]
        return _layernorm(h, pp["g"], pp["be"])

    # text encoder stand-in: one self-attention block, full rows, then CLS token
    x = txt["tok_emb"][cap_idx] + txt["pos_emb"][None]                        # (B, SEQ, 32)
    q = x @ txt["wq"] + txt["bq"]
    k = x @ txt["wk"] + txt["bk"]
    v = x @ txt["wv"] + txt["bv"]
    s = jnp.einsum("bqd,bkd->bqk", q, k) * (1.0 / math.sqrt(TEXT_EMBED))
    s = s + jnp.where(atten_msk[:, None, :] > 0, 0.0, -1e30)
    a = jax.nn.softmax(s, axis=-1)
    ao = jnp.einsum("bqk,bkd->bqd", a, v) @ txt["wo"] + txt["bo"]
    x1 = _layernorm(x + ao, txt["ln1_g"], txt["ln1_b"])
    f = _gelu(x1 @ txt["wf1"] + txt["cf1"]) @ txt["wf2"] + txt["cf2"]
    x2 = _layernorm(x1 + f, txt["ln2_g"], txt["ln2_b"])
    cls = x2[:, 0, :]                                                         # (B, 32)
    return proj(feat, ip), proj(cls, tp)


# --------------------------- deterministic params ---------------------------
def init_params(key):
    keys = iter(jax.random.split(key, 64))

    def nrm(shape, scale=0.05):
        return scale * jax.random.normal(next(keys), shape, dtype=jnp.float32)

    params = {
        "img_w": nrm((PATCH_DIM, IMAGE_EMBED)),
        "img_b": nrm((1, IMAGE_EMBED)),
    }
    params["txt"] = {
        "tok_emb": nrm((VOCAB, TEXT_EMBED)),
        "pos_emb": nrm((SEQ, TEXT_EMBED)),
        "wq": nrm((TEXT_EMBED, TEXT_EMBED)), "bq": nrm((1, TEXT_EMBED)),
        "wk": nrm((TEXT_EMBED, TEXT_EMBED)), "bk": nrm((1, TEXT_EMBED)),
        "wv": nrm((TEXT_EMBED, TEXT_EMBED)), "bv": nrm((1, TEXT_EMBED)),
        "wo": nrm((TEXT_EMBED, TEXT_EMBED)), "bo": nrm((1, TEXT_EMBED)),
        "ln1_g": jnp.ones((1, TEXT_EMBED), jnp.float32),
        "ln1_b": jnp.zeros((1, TEXT_EMBED), jnp.float32),
        "wf1": nrm((TEXT_EMBED, FFN_DIM)), "cf1": nrm((1, FFN_DIM)),
        "wf2": nrm((FFN_DIM, TEXT_EMBED)), "cf2": nrm((1, TEXT_EMBED)),
        "ln2_g": jnp.ones((1, TEXT_EMBED), jnp.float32),
        "ln2_b": jnp.zeros((1, TEXT_EMBED), jnp.float32),
    }

    def proj(E):
        # ProjectionHead: Linear -> GELU -> Linear -> Dropout(eval=identity) -> LayerNorm
        return {
            "w1": nrm((E, PROJ_DIM)), "b1": nrm((1, PROJ_DIM)),
            "w2": nrm((PROJ_DIM, PROJ_DIM)), "b2": nrm((1, PROJ_DIM)),
            "g": jnp.ones((1, PROJ_DIM), jnp.float32),
            "be": jnp.zeros((1, PROJ_DIM), jnp.float32),
        }

    params["img_proj"] = proj(IMAGE_EMBED)
    params["txt_proj"] = proj(TEXT_EMBED)
    return params


# ----------------------------------- main -----------------------------------
if __name__ == "__main__":
    key = jax.random.PRNGKey(0)
    k_img, k_ids, k_params = jax.random.split(key, 3)

    img = jax.random.normal(k_img, (B, IMG_C, IMG_H, IMG_W), dtype=jnp.float32)
    cap_idx = jax.random.randint(k_ids, (B, SEQ), 0, VOCAB, dtype=jnp.int32)
    # attention mask: pad the last two tokens of the second sequence
    atten_msk = jnp.ones((B, SEQ), dtype=jnp.int32).at[1, SEQ - 2:].set(0)

    params = init_params(k_params)

    fwd = jax.jit(clip_forward)
    image_embeddings, text_embeddings = fwd(params, img, cap_idx, atten_msk)
    jax.block_until_ready((image_embeddings, text_embeddings))

    assert image_embeddings.shape == (B, PROJ_DIM)
    assert text_embeddings.shape == (B, PROJ_DIM)
    assert bool(jnp.all(jnp.isfinite(image_embeddings)))
    assert bool(jnp.all(jnp.isfinite(text_embeddings)))

    ref_img, ref_txt = jax.jit(_reference_forward)(params, img, cap_idx, atten_msk)
    err = max(float(jnp.max(jnp.abs(image_embeddings - ref_img))),
              float(jnp.max(jnp.abs(text_embeddings - ref_txt))))
    assert err < 5e-2, f"kernel/reference mismatch: max abs err {err}"

    print("KERNEL_OK")
</pallas_src>

<mosaic_0001>
module attributes {stable_mosaic.version = 11 : i64} {
  func.func @_clip_fused_kernel(%arg0: i32, %arg1: memref<1x24x128xf32, #tpu.memory_space<vmem>>, %arg2: memref<528x128xf32, #tpu.memory_space<vmem>>, %arg3: memref<16x128xf32, #tpu.memory_space<vmem>>, %arg4: memref<1x2x128xf32, #tpu.memory_space<vmem>>) attributes {dimension_semantics = [#tpu.dimension_semantics<parallel>], iteration_bounds = array<i64: 2>, scalar_prefetch = 0 : i64, scratch_operands = 0 : i64, tpu.core_type = #tpu.core_type<tc>, window_params = [{transform_indices = @transform_0, window_bounds = array<i64: 1, 24, 128>}, {pipeline_mode = #tpu.pipeline_mode<synchronous>, transform_indices = @transform_1, window_bounds = array<i64: 528, 128>}, {pipeline_mode = #tpu.pipeline_mode<synchronous>, transform_indices = @transform_2, window_bounds = array<i64: 16, 128>}, {transform_indices = @transform_3, window_bounds = array<i64: 1, 2, 128>}]} {
    %c0 = arith.constant 0 : index
    %c0_0 = arith.constant 0 : index
    %0 = vector.load %arg3[%c0, %c0_0] : memref<16x128xf32, #tpu.memory_space<vmem>>, vector<16x128xf32>
    %c0_1 = arith.constant 0 : index
    %c0_2 = arith.constant 0 : index
    %c0_3 = arith.constant 0 : index
    %1 = vector.load %arg1[%c0_1, %c0_2, %c0_3] : memref<1x24x128xf32, #tpu.memory_space<vmem>>, vector<1x1x48xf32>
    %2 = vector.shape_cast %1 : vector<1x1x48xf32> to vector<1x48xf32>
    %c0_4 = arith.constant 0 : index
    %c0_5 = arith.constant 0 : index
    %3 = vector.load %arg2[%c0_4, %c0_5] : memref<528x128xf32, #tpu.memory_space<vmem>>, vector<48x128xf32>
    %cst = arith.constant dense<0.000000e+00> : vector<1x128xf32>
    %4 = tpu.matmul %2, %3, %cst {dimension_numbers = #tpu.dot_dimension_numbers<[1], [0], [0], [1], [0, 0, 1, 1], [], []>} : vector<1x48xf32>, vector<48x128xf32>, vector<1x128xf32> -> vector<1x128xf32>
    %5 = vector.extract_strided_slice %0 {offsets = [0, 0], sizes = [1, 128], strides = [1, 1]} : vector<16x128xf32> to vector<1x128xf32>
    %6 = arith.addf %4, %5 : vector<1x128xf32>
    %c0_6 = arith.constant 0 : index
    %c8 = arith.constant 8 : index
    %c0_7 = arith.constant 0 : index
    %7 = vector.load %arg1[%c0_6, %c8, %c0_7] : memref<1x24x128xf32, #tpu.memory_space<vmem>>, vector<1x8x32xf32>
    %8 = vector.shape_cast %7 : vector<1x8x32xf32> to vector<8x32xf32>
    %c48 = arith.constant 48 : index
    %c0_8 = arith.constant 0 : index
    %9 = vector.load %arg2[%c48, %c0_8] : memref<528x128xf32, #tpu.memory_space<vmem>>, vector<32x96xf32>
    %cst_9 = arith.constant dense<0.000000e+00> : vector<8x96xf32>
    %10 = tpu.matmul %8, %9, %cst_9 {dimension_numbers = #tpu.dot_dimension_numbers<[1], [0], [0], [1], [0, 0, 1, 1], [], []>} : vector<8x32xf32>, vector<32x96xf32>, vector<8x96xf32> -> vector<8x96xf32>
    %11 = vector.extract_strided_slice %0 {offsets = [1, 0], sizes = [1, 96], strides = [1, 1]} : vector<16x128xf32> to vector<1x96xf32>
    %12 = vector.broadcast %11 : vector<1x96xf32> to vector<8x96xf32>
    %13 = arith.addf %10, %12 : vector<8x96xf32>
    %14 = vector.extract_strided_slice %13 {offsets = [0, 32], sizes = [8, 32], strides = [1, 1]} : vector<8x96xf32> to vector<8x32xf32>
    %15 = vector.extract_strided_slice %13 {offsets = [0, 64], sizes = [8, 32], strides = [1, 1]} : vector<8x96xf32> to vector<8x32xf32>
    %16 = vector.shape_cast %13 : vector<8x96xf32> to vector<1x8x96xf32>
    %17 = vector.extract_strided_slice %16 {offsets = [0, 0, 0], sizes = [1, 1, 32], strides = [1, 1, 1]} : vector<1x8x96xf32> to vector<1x1x32xf32>
    %18 = vector.shape_cast %17 : vector<1x1x32xf32> to vector<1x32xf32>
    %19 = vector.shape_cast %8 : vector<8x32xf32> to vector<1x8x32xf32>
    %20 = vector.extract_strided_slice %19 {offsets = [0, 0, 0], sizes = [1, 1, 32], strides = [1, 1, 1]} : vector<1x8x32xf32> to vector<1x1x32xf32>
    %21 = vector.shape_cast %20 : vector<1x1x32xf32> to vector<1x32xf32>
    %22 = tpu.iota {dimensions = array<i32: 1>} : vector<1x8xi32>
    %23 = tpu.iota {dimensions = array<i32: 0>} : vector<1x8xi32>
    %c8_i32 = arith.constant 8 : i32
    %24 = vector.broadcast %c8_i32 : i32 to vector<1x8xi32>
    %25 = arith.muli %23, %24 : vector<1x8xi32>
    %26 = arith.cmpi sge, %22, %25 : vector<1x8xi32>
    %c1_i32 = arith.constant 1 : i32
    %27 = vector.broadcast %c1_i32 : i32 to vector<1x8xi32>
    %28 = arith.addi %23, %27 : vector<1x8xi32>
    %c8_i32_10 = arith.constant 8 : i32
    %29 = vector.broadcast %c8_i32_10 : i32 to vector<1x8xi32>
    %30 = arith.muli %28, %29 : vector<1x8xi32>
    %31 = arith.cmpi slt, %22, %30 : vector<1x8xi32>
    %32 = arith.andi %26, %31 : vector<1x8xi1>
    %c0_11 = arith.constant 0 : index
    %c16 = arith.constant 16 : index
    %c0_12 = arith.constant 0 : index
    %33 = vector.load %arg1[%c0_11, %c16, %c0_12] : memref<1x24x128xf32, #tpu.memory_space<vmem>>, vector<1x1x8xf32>
    %34 = vector.shape_cast %33 : vector<1x1x8xf32> to vector<1x8xf32>
    %cst_13 = arith.constant 0.000000e+00 : f32
    %35 = vector.broadcast %cst_13 : f32 to vector<1x8xf32>
    %36 = arith.cmpf ogt, %34, %35 : vector<1x8xf32>
    %37 = arith.andi %32, %36 : vector<1x8xi1>
    %cst_14 = arith.constant 0.000000e+00 : f32
    %cst_15 = arith.constant -1.000000e+30 : f32
    %38 = vector.broadcast %cst_14 : f32 to vector<1x8xf32>
    %39 = vector.broadcast %cst_15 : f32 to vector<1x8xf32>
    %40 = arith.select %37, %38, %39 : vector<1x8xi1>, vector<1x8xf32>
    %cst_16 = arith.constant dense<0.000000e+00> : vector<1x8xf32>
    %41 = tpu.matmul %18, %14, %cst_16 {dimension_numbers = #tpu.dot_dimension_numbers<[1], [1], [0], [0], [0, 0, 1, 0], [], []>} : vector<1x32xf32>, vector<8x32xf32>, vector<1x8xf32> -> vector<1x8xf32>
    %cst_17 = arith.constant 0.176776692 : f32
    %42 = vector.broadcast %cst_17 : f32 to vector<1x8xf32>
    %43 = arith.mulf %41, %42 : vector<1x8xf32>
    %44 = arith.addf %43, %40 : vector<1x8xf32>
    %cst_18 = arith.constant dense<0xFF800000> : vector<1xf32>
    %45 = vector.multi_reduction <maximumf>, %44, %cst_18 [1] : vector<1x8xf32> to vector<1xf32>
    %46 = vector.shape_cast %45 : vector<1xf32> to vector<1x1xf32>
    %47 = vector.broadcast %46 : vector<1x1xf32> to vector<1x8xf32>
    %48 = arith.subf %44, %47 : vector<1x8xf32>
    %49 = math.exp %48 : vector<1x8xf32>
    %cst_19 = arith.constant dense<0.000000e+00> : vector<1xf32>
    %50 = vector.multi_reduction <add>, %49, %cst_19 [1] : vector<1x8xf32> to vector<1xf32>
    %51 = vector.shape_cast %50 : vector<1xf32> to vector<1x1xf32>
    %52 = vector.broadcast %51 : vector<1x1xf32> to vector<1x8xf32>
    %53 = arith.divf %49, %52 : vector<1x8xf32>
    %cst_20 = arith.constant dense<0.000000e+00> : vector<1x32xf32>
    %54 = tpu.matmul %53, %15, %cst_20 {dimension_numbers = #tpu.dot_dimension_numbers<[1], [0], [0], [1], [0, 0, 1, 1], [], []>} : vector<1x8xf32>, vector<8x32xf32>, vector<1x32xf32> -> vector<1x32xf32>
    %c80 = arith.constant 80 : index
    %c0_21 = arith.constant 0 : index
    %55 = vector.load %arg2[%c80, %c0_21] : memref<528x128xf32, #tpu.memory_space<vmem>>, vector<32x32xf32>
    %cst_22 = arith.constant dense<0.000000e+00> : vector<1x32xf32>
    %56 = tpu.matmul %54, %55, %cst_22 {dimension_numbers = #tpu.dot_dimension_numbers<[1], [0], [0], [1], [0, 0, 1, 1], [], []>} : vector<1x32xf32>, vector<32x32xf32>, vector<1x32xf32> -> vector<1x32xf32>
    %57 = vector.extract_strided_slice %0 {offsets = [2, 0], sizes = [1, 32], strides = [1, 1]} : vector<16x128xf32> to vector<1x32xf32>
    %58 = arith.addf %56, %57 : vector<1x32xf32>
    %59 = arith.addf %21, %58 : vector<1x32xf32>
    %60 = vector.extract_strided_slice %0 {offsets = [3, 0], sizes = [1, 32], strides = [1, 1]} : vector<16x128xf32> to vector<1x32xf32>
    %61 = vector.extract_strided_slice %0 {offsets = [4, 0], sizes = [1, 32], strides = [1, 1]} : vector<16x128xf32> to vector<1x32xf32>
    %cst_23 = arith.constant dense<0.000000e+00> : vector<1xf32>
    %62 = vector.multi_reduction <add>, %59, %cst_23 [1] : vector<1x32xf32> to vector<1xf32>
    %63 = vector.shape_cast %62 : vector<1xf32> to vector<1x1xf32>
    %cst_24 = arith.constant 3.200000e+01 : f32
    %64 = vector.broadcast %cst_24 : f32 to vector<1x1xf32>
    %65 = arith.divf %63, %64 : vector<1x1xf32>
    %66 = vector.broadcast %65 : vector<1x1xf32> to vector<1x32xf32>
    %67 = arith.subf %59, %66 : vector<1x32xf32>
    %68 = arith.mulf %67, %67 : vector<1x32xf32>
    %cst_25 = arith.constant dense<0.000000e+00> : vector<1xf32>
    %69 = vector.multi_reduction <add>, %68, %cst_25 [1] : vector<1x32xf32> to vector<1xf32>
    %70 = vector.shape_cast %69 : vector<1xf32> to vector<1x1xf32>
    %cst_26 = arith.constant 3.200000e+01 : f32
    %71 = vector.broadcast %cst_26 : f32 to vector<1x1xf32>
    %72 = arith.divf %70, %71 : vector<1x1xf32>
    %73 = vector.broadcast %65 : vector<1x1xf32> to vector<1x32xf32>
    %74 = arith.subf %59, %73 : vector<1x32xf32>
    %cst_27 = arith.constant 9.99999974E-6 : f32
    %75 = vector.broadcast %cst_27 : f32 to vector<1x1xf32>
    %76 = arith.addf %72, %75 : vector<1x1xf32>
    %77 = math.rsqrt %76 : vector<1x1xf32>
    %78 = vector.broadcast %77 : vector<1x1xf32> to vector<1x32xf32>
    %79 = arith.mulf %74, %78 : vector<1x32xf32>
    %80 = arith.mulf %79, %60 : vector<1x32xf32>
    %81 = arith.addf %80, %61 : vector<1x32xf32>
    %c112 = arith.constant 112 : index
    %c0_28 = arith.constant 0 : index
    %82 = vector.load %arg2[%c112, %c0_28] : memref<528x128xf32, #tpu.memory_space<vmem>>, vector<32x128xf32>
    %cst_29 = arith.constant dense<0.000000e+00> : vector<1x128xf32>
    %83 = tpu.matmul %81, %82, %cst_29 {dimension_numbers = #tpu.dot_dimension_numbers<[1], [0], [0], [1], [0, 0, 1, 1], [], []>} : vector<1x32xf32>, vector<32x128xf32>, vector<1x128xf32> -> vector<1x128xf32>
    %84 = vector.extract_strided_slice %0 {offsets = [5, 0], sizes = [1, 128], strides = [1, 1]} : vector<16x128xf32> to vector<1x128xf32>
    %85 = arith.addf %83, %84 : vector<1x128xf32>
    %cst_30 = arith.constant 5.000000e-01 : f32
    %86 = vector.broadcast %cst_30 : f32 to vector<1x128xf32>
    %87 = arith.mulf %86, %85 : vector<1x128xf32>
    %cst_31 = arith.constant 4.471500e-02 : f32
    %88 = vector.broadcast %cst_31 : f32 to vector<1x128xf32>
    %89 = arith.mulf %88, %85 : vector<1x128xf32>
    %90 = arith.mulf %89, %85 : vector<1x128xf32>
    %91 = arith.mulf %90, %85 : vector<1x128xf32>
    %92 = arith.addf %85, %91 : vector<1x128xf32>
    %cst_32 = arith.constant 0.797884583 : f32
    %93 = vector.broadcast %cst_32 : f32 to vector<1x128xf32>
    %94 = arith.mulf %93, %92 : vector<1x128xf32>
    %95 = math.tanh %94 : vector<1x128xf32>
    %cst_33 = arith.constant 1.000000e+00 : f32
    %96 = vector.broadcast %cst_33 : f32 to vector<1x128xf32>
    %97 = arith.addf %96, %95 : vector<1x128xf32>
    %98 = arith.mulf %87, %97 : vector<1x128xf32>
    %c144 = arith.constant 144 : index
    %c0_34 = arith.constant 0 : index
    %99 = vector.load %arg2[%c144, %c0_34] : memref<528x128xf32, #tpu.memory_space<vmem>>, vector<128x32xf32>
    %cst_35 = arith.constant dense<0.000000e+00> : vector<1x32xf32>
    %100 = tpu.matmul %98, %99, %cst_35 {dimension_numbers = #tpu.dot_dimension_numbers<[1], [0], [0], [1], [0, 0, 1, 1], [], []>} : vector<1x128xf32>, vector<128x32xf32>, vector<1x32xf32> -> vector<1x32xf32>
    %101 = vector.extract_strided_slice %0 {offsets = [6, 0], sizes = [1, 32], strides = [1, 1]} : vector<16x128xf32> to vector<1x32xf32>
    %102 = arith.addf %100, %101 : vector<1x32xf32>
    %103 = arith.addf %81, %102 : vector<1x32xf32>
    %104 = vector.extract_strided_slice %0 {offsets = [7, 0], sizes = [1, 32], strides = [1, 1]} : vector<16x128xf32> to vector<1x32xf32>
    %105 = vector.extract_strided_slice %0 {offsets = [8, 0], sizes = [1, 32], strides = [1, 1]} : vector<16x128xf32> to vector<1x32xf32>
    %cst_36 = arith.constant dense<0.000000e+00> : vector<1xf32>
    %106 = vector.multi_reduction <add>, %103, %cst_36 [1] : vector<1x32xf32> to vector<1xf32>
    %107 = vector.shape_cast %106 : vector<1xf32> to vector<1x1xf32>
    %cst_37 = arith.constant 3.200000e+01 : f32
    %108 = vector.broadcast %cst_37 : f32 to vector<1x1xf32>
    %109 = arith.divf %107, %108 : vector<1x1xf32>
    %110 = vector.broadcast %109 : vector<1x1xf32> to vector<1x32xf32>
    %111 = arith.subf %103, %110 : vector<1x32xf32>
    %112 = arith.mulf %111, %111 : vector<1x32xf32>
    %cst_38 = arith.constant dense<0.000000e+00> : vector<1xf32>
    %113 = vector.multi_reduction <add>, %112, %cst_38 [1] : vector<1x32xf32> to vector<1xf32>
    %114 = vector.shape_cast %113 : vector<1xf32> to vector<1x1xf32>
    %cst_39 = arith.constant 3.200000e+01 : f32
    %115 = vector.broadcast %cst_39 : f32 to vector<1x1xf32>
    %116 = arith.divf %114, %115 : vector<1x1xf32>
    %117 = vector.broadcast %109 : vector<1x1xf32> to vector<1x32xf32>
    %118 = arith.subf %103, %117 : vector<1x32xf32>
    %cst_40 = arith.constant 9.99999974E-6 : f32
    %119 = vector.broadcast %cst_40 : f32 to vector<1x1xf32>
    %120 = arith.addf %116, %119 : vector<1x1xf32>
    %121 = math.rsqrt %120 : vector<1x1xf32>
    %122 = vector.broadcast %121 : vector<1x1xf32> to vector<1x32xf32>
    %123 = arith.mulf %118, %122 : vector<1x32xf32>
    %124 = arith.mulf %123, %104 : vector<1x32xf32>
    %125 = arith.addf %124, %105 : vector<1x32xf32>
    %cst_41 = arith.constant 0.000000e+00 : f32
    %126 = vector.broadcast %cst_41 : f32 to vector<1x64xf32>
    %cst_42 = arith.constant 0.000000e+00 : f32
    %127 = vector.broadcast %cst_42 : f32 to vector<1x32xf32>
    %128 = tpu.concatenate %126, %125, %127 in 1 : vector<1x64xf32>, vector<1x32xf32>, vector<1x32xf32> -> vector<1x128xf32>
    %129 = tpu.concatenate %6, %128 in 0 : vector<1x128xf32>, vector<1x128xf32> -> vector<2x128xf32>
    %c272 = arith.constant 272 : index
    %c0_43 = arith.constant 0 : index
    %130 = vector.load %arg2[%c272, %c0_43] : memref<528x128xf32, #tpu.memory_space<vmem>>, vector<128x128xf32>
    %cst_44 = arith.constant dense<0.000000e+00> : vector<2x128xf32>
    %131 = tpu.matmul %129, %130, %cst_44 {dimension_numbers = #tpu.dot_dimension_numbers<[1], [0], [0], [1], [0, 0, 1, 1], [], []>} : vector<2x128xf32>, vector<128x128xf32>, vector<2x128xf32> -> vector<2x128xf32>
    %132 = vector.extract_strided_slice %0 {offsets = [9, 0], sizes = [1, 128], strides = [1, 1]} : vector<16x128xf32> to vector<1x128xf32>
    %133 = vector.broadcast %132 : vector<1x128xf32> to vector<2x128xf32>
    %134 = arith.addf %131, %133 : vector<2x128xf32>
    %cst_45 = arith.constant 5.000000e-01 : f32
    %135 = vector.broadcast %cst_45 : f32 to vector<2x128xf32>
    %136 = arith.mulf %135, %134 : vector<2x128xf32>
    %cst_46 = arith.constant 4.471500e-02 : f32
    %137 = vector.broadcast %cst_46 : f32 to vector<2x128xf32>
    %138 = arith.mulf %137, %134 : vector<2x128xf32>
    %139 = arith.mulf %138, %134 : vector<2x128xf32>
    %140 = arith.mulf %139, %134 : vector<2x128xf32>
    %141 = arith.addf %134, %140 : vector<2x128xf32>
    %cst_47 = arith.constant 0.797884583 : f32
    %142 = vector.broadcast %cst_47 : f32 to vector<2x128xf32>
    %143 = arith.mulf %142, %141 : vector<2x128xf32>
    %144 = math.tanh %143 : vector<2x128xf32>
    %cst_48 = arith.constant 1.000000e+00 : f32
    %145 = vector.broadcast %cst_48 : f32 to vector<2x128xf32>
    %146 = arith.addf %145, %144 : vector<2x128xf32>
    %147 = arith.mulf %136, %146 : vector<2x128xf32>
    %c400 = arith.constant 400 : index
    %c0_49 = arith.constant 0 : index
    %148 = vector.load %arg2[%c400, %c0_49] : memref<528x128xf32, #tpu.memory_space<vmem>>, vector<128x128xf32>
    %cst_50 = arith.constant dense<0.000000e+00> : vector<2x128xf32>
    %149 = tpu.matmul %147, %148, %cst_50 {dimension_numbers = #tpu.dot_dimension_numbers<[1], [0], [0], [1], [0, 0, 1, 1], [], []>} : vector<2x128xf32>, vector<128x128xf32>, vector<2x128xf32> -> vector<2x128xf32>
    %150 = vector.extract_strided_slice %0 {offsets = [10, 0], sizes = [1, 128], strides = [1, 1]} : vector<16x128xf32> to vector<1x128xf32>
    %151 = vector.broadcast %150 : vector<1x128xf32> to vector<2x128xf32>
    %152 = arith.addf %149, %151 : vector<2x128xf32>
    %153 = tpu.iota {dimensions = array<i32: 1>} : vector<2x128xi32>
    %154 = tpu.iota {dimensions = array<i32: 0>} : vector<2x128xi32>
    %c1_i32_51 = arith.constant 1 : i32
    %155 = vector.broadcast %c1_i32_51 : i32 to vector<2x128xi32>
    %156 = arith.cmpi slt, %154, %155 : vector<2x128xi32>
    %c32_i32 = arith.constant 32 : i32
    %157 = vector.broadcast %c32_i32 : i32 to vector<2x128xi32>
    %158 = arith.cmpi slt, %153, %157 : vector<2x128xi32>
    %159 = arith.andi %156, %158 : vector<2x128xi1>
    %cst_52 = arith.constant dense<true> : vector<2x128xi1>
    %160 = arith.xori %156, %cst_52 : vector<2x128xi1>
    %c32_i32_53 = arith.constant 32 : i32
    %161 = vector.broadcast %c32_i32_53 : i32 to vector<2x128xi32>
    %162 = arith.cmpi sge, %153, %161 : vector<2x128xi32>
    %c64_i32 = arith.constant 64 : i32
    %163 = vector.broadcast %c64_i32 : i32 to vector<2x128xi32>
    %164 = arith.cmpi slt, %153, %163 : vector<2x128xi32>
    %165 = arith.andi %162, %164 : vector<2x128xi1>
    %166 = arith.andi %160, %165 : vector<2x128xi1>
    %167 = arith.ori %159, %166 : vector<2x128xi1>
    %cst_54 = arith.constant 0.000000e+00 : f32
    %168 = vector.broadcast %cst_54 : f32 to vector<2x128xf32>
    %169 = arith.select %167, %152, %168 : vector<2x128xi1>, vector<2x128xf32>
    %cst_55 = arith.constant dense<0.000000e+00> : vector<2xf32>
    %170 = vector.multi_reduction <add>, %169, %cst_55 [1] : vector<2x128xf32> to vector<2xf32>
    %171 = vector.shape_cast %170 : vector<2xf32> to vector<2x1xf32>
    %cst_56 = arith.constant 3.125000e-02 : f32
    %172 = vector.broadcast %cst_56 : f32 to vector<2x1xf32>
    %173 = arith.mulf %171, %172 : vector<2x1xf32>
    %174 = vector.broadcast %173 : vector<2x1xf32> to vector<2x128xf32>
    %175 = arith.subf %152, %174 : vector<2x128xf32>
    %cst_57 = arith.constant 0.000000e+00 : f32
    %176 = vector.broadcast %cst_57 : f32 to vector<2x128xf32>
    %177 = arith.select %167, %175, %176 : vector<2x128xi1>, vector<2x128xf32>
    %178 = arith.mulf %177, %177 : vector<2x128xf32>
    %cst_58 = arith.constant dense<0.000000e+00> : vector<2xf32>
    %179 = vector.multi_reduction <add>, %178, %cst_58 [1] : vector<2x128xf32> to vector<2xf32>
    %180 = vector.shape_cast %179 : vector<2xf32> to vector<2x1xf32>
    %cst_59 = arith.constant 3.125000e-02 : f32
    %181 = vector.broadcast %cst_59 : f32 to vector<2x1xf32>
    %182 = arith.mulf %180, %181 : vector<2x1xf32>
    %cst_60 = arith.constant 9.99999974E-6 : f32
    %183 = vector.broadcast %cst_60 : f32 to vector<2x1xf32>
    %184 = arith.addf %182, %183 : vector<2x1xf32>
    %185 = math.rsqrt %184 : vector<2x1xf32>
    %186 = vector.broadcast %185 : vector<2x1xf32> to vector<2x128xf32>
    %187 = arith.mulf %177, %186 : vector<2x128xf32>
    %188 = vector.extract_strided_slice %0 {offsets = [11, 0], sizes = [1, 128], strides = [1, 1]} : vector<16x128xf32> to vector<1x128xf32>
    %189 = vector.broadcast %188 : vector<1x128xf32> to vector<2x128xf32>
    %190 = arith.mulf %187, %189 : vector<2x128xf32>
    %191 = vector.extract_strided_slice %0 {offsets = [12, 0], sizes = [1, 128], strides = [1, 1]} : vector<16x128xf32> to vector<1x128xf32>
    %192 = vector.broadcast %191 : vector<1x128xf32> to vector<2x128xf32>
    %193 = arith.addf %190, %192 : vector<2x128xf32>
    %c0_61 = arith.constant 0 : index
    %c0_62 = arith.constant 0 : index
    %c0_63 = arith.constant 0 : index
    %194 = vector.load %arg4[%c0_61, %c0_62, %c0_63] : memref<1x2x128xf32, #tpu.memory_space<vmem>>, vector<1x2x128xf32>
    %195 = vector.shape_cast %194 : vector<1x2x128xf32> to vector<2x128xf32>
    %196 = vector.shape_cast %193 : vector<2x128xf32> to vector<1x2x128xf32>
    tpu.vector_store %arg4[%c0_61, %c0_62, %c0_63], %196 {strides = array<i32>} : memref<1x2x128xf32, #tpu.memory_space<vmem>>, vector<1x2x128xf32>,
    return
  }
  func.func @transform_0(%arg0: i32) -> (i32, i32, i32) {
    %c0_i32 = arith.constant 0 : i32
    %c0_i32_0 = arith.constant 0 : i32
    %c0_i32_1 = arith.constant 0 : i32
    return %arg0, %c0_i32, %c0_i32_0 : i32, i32, i32
  }
  func.func @transform_1(%arg0: i32) -> (i32, i32) {
    %c0_i32 = arith.constant 0 : i32
    %c0_i32_0 = arith.constant 0 : i32
    %c0_i32_1 = arith.constant 0 : i32
    return %c0_i32, %c0_i32_0 : i32, i32
  }
  func.func @transform_2(%arg0: i32) -> (i32, i32) {
    %c0_i32 = arith.constant 0 : i32
    %c0_i32_0 = arith.constant 0 : i32
    %c0_i32_1 = arith.constant 0 : i32
    return %c0_i32, %c0_i32_0 : i32, i32
  }
  func.func @transform_3(%arg0: i32) -> (i32, i32, i32) {
    %c0_i32 = arith.constant 0 : i32
    %c0_i32_0 = arith.constant 0 : i32
    %c0_i32_1 = arith.constant 0 : i32
    return %arg0, %c0_i32, %c0_i32_0 : i32, i32, i32
  }
}

</mosaic_0001>

<bundles_post_ra>
// kernel: clip_forward.1
= control target key start
LH: loop header
LB: loop body
LE: loop exit
PB: predicated region body
PF: predicated region fallthrough
CT: control target
= control target key end

     0   :  { %s1423_s12 = smov 0   ;;  %s1798_s0 = inlined_call_operand.vmem [shape: f32[2,24,128], index: 0, kind: input, shape index: {}]   ;;  %s1799_s1 = inlined_call_operand.vmem [shape: f32[528,128], index: 1, kind: input, shape index: {}]   ;;  %s1800_s2 = inlined_call_operand.vmem [shape: f32[16,128], index: 2, kind: input, shape index: {}]   ;;  %s1801_s3 = inlined_call_operand.vmem [shape: f32[2,2,128], index: 3, kind: output, shape index: {}]  }
   0x1 LB: > { %s1104_s13 = sadd.s32 4294967295, %s1395_s12   ;;  %p1108_p0 = scmp.ge.s32.totalorder %s1395_s12, 1  ;;  %s1395_s12 = sphi %s1423_s12, %s13_s12  }
   0x2   : > { %p137_p1 = scmp.lt.s32.totalorder %s1395_s12, 3 }
   0x4   : > { %p138_p2 = pnand %p1108_p0, %p137_p1 }
   0x5   : > { %p160_p3 = scmp.lt.s32.totalorder (!%p138_p2), %s1104_s13, 1  ;;  %s1399_s15 = smov (!%p138_p2), 96  }
   0x6   : > { %141 = sbr.rel (%p138_p2) target bundleno = 3129 (0xc39), region = 32  ;;  %s1401_s16 = smov (!%p138_p2), 64  }
   0xb   : > { %v177_v0 = vld [vmem:[%s1799_s1 + $0x28] sm:$0xff]  ;;  %v1397_v1 = vmov 0.0   ;;  %v176_v2 = vld [vmem:[%s1799_s1 + $0x20] sm:$0xff]  ;;  %vm1398_vm0 = vmmov 0   ;;  %s1803_s13 = smov (!%p160_p3, %s1104_s13), 1  ;;  %v175_v3 = vld [vmem:[%s1799_s1 + $0x18] sm:$0xff]  ;;  %v257_v13 = vlaneseq }
   0xc   : > { %1197 = vmatprep.subr.mxu0 %v1397_v1  ;;  %1209 = vmatprep.mubr.msk.f32.mxu0 %vm1398_vm0, %v1397_v1  ;;  %s1360_s20 = smul.u32 24, %s1803_s13  ;;  %v174_v4 = vld [vmem:[%s1799_s1 + $0x10] sm:$0xff]  ;;  %v173_v5 = vld [vmem:[%s1799_s1 + $0x8] sm:$0xff]  ;;  %v172_v6 = vld [vmem:[%s1799_s1] sm:$0xff]  ;;  %vm178_vm1 = vcmask 392192   ;;  %vm261_vm2 = vcmask 261120  }
   0xd   : > { %1198 = vmatpush3.msra.mxu0 %v177_v0  ;;  %1233 = vmatprep.subr.mxu1 %v1397_v1  ;;  %v256_v8 = vld [vmem:[%s1799_s1 + $0x48] sm:$0xff]  ;;  %v255_v9 = vld [vmem:[%s1799_s1 + $0x40] sm:$0xff]  ;;  %v254_v10 = vld [vmem:[%s1799_s1 + $0x38] sm:$0xff]  ;;  %v1495_v14 = vshrl.u32 %v257_v13, 7  ;;  %v1514_v25 = vand.u32 127, %v257_v13  ;;  %vm428_vm8 = vcmask 57344  }
   0xe   : > { %1199 = vmatprep.subr.mxu0 %v1397_v1  ;;  %1241 = vmatprep.mubr.msk.f32.mxu1 %vm1398_vm0, %v1397_v1  ;;  %s1461_s27 = scalar_lea.vmem %s1798_s0, %s1360_s20  ;;  %v253_v11 = vld [vmem:[%s1799_s1 + $0x30] sm:$0xff]  ;;  %v1503_v18 = vld [vmem:[%s1800_s2] sm:$0xff]  ;;  %v1400_v30 = vmov -1e+30   ;;  %v520_v41 = vld [vmem:[%s1799_s1 + $0x68] sm:$0xff]  ;;  %vm443_vm9 = vcmask 64512  }
   0xf   : > { %1200 = vmatpush3.msra.mxu0 %v176_v2  ;;  %v171_v7 = vld [vmem:[%s1461_s27] sm:$0x1]  ;;  %v1487_v12 = vld [vmem:[%s1461_s27 + $0x8] sm:$0xff]  ;;  %v259_v16 = vsub.s32 1, %v1495_v14  ;;  %v341_v24 = vadd.s32 1, %v1495_v14  ;;  %v339_v26 = vmul.u32 8, %v1495_v14  ;;  %1234 = vmatpush3.msra.mxu1 %v520_v41 }
  0x10   : > { %1201 = vmatprep.subr.mxu0 %v1397_v1  ;;  %v345_v28 = vld [vmem:[%s1461_s27 + $0x10] sm:$0x1]  ;;  %v519_v42 = vld [vmem:[%s1799_s1 + $0x60] sm:$0xff]  ;;  %1235 = vmatprep.subr.mxu1 %v1397_v1  ;;  %v518_v43 = vld [vmem:[%s1799_s1 + $0x58] sm:$0xff]  ;;  %v522_v51 = vrot.slane %v1503_v18, 2  ;;  %vm598_vm10 = vcmask 253952  }
  0x11   : > { %1202 = vmatpush3.msra.mxu0 %v175_v3  ;;  %v260_v19 = vrot.slane %v1503_v18, %v259_v16  ;;  %v342_v27 = vmul.u32 8, %v341_v24  ;;  %vm340_vm3 = vcmp.ge.s32.totalorder %v1514_v25, %v339_v26  ;;  %vm346_vm6 = vcmp.gt.f32.partialorder %v345_v28, 0.0  ;;  %1236 = vmatpush3.msra.mxu1 %v519_v42  ;;  %v517_v48 = vld [vmem:[%s1799_s1 + $0x50] sm:$0xff]  ;;  %v622_v62 = vld [vmem:[%s1799_s1 + $0x88] sm:$0xff]  ;;  %v621_v63 = vld [vmem:[%s1799_s1 + $0x80] sm:$0xff]  ;;  %s1110_s6 = sshll.u32 %s1803_s13, 1 }
  0x12   : > { %1203 = vmatprep.subr.mxu0 %v1397_v1  ;;  %1237 = vmatprep.subr.mxu1 %v1397_v1  ;;  %v620_v0 = vld [vmem:[%s1799_s1 + $0x78] sm:$0xff]  ;;  %v619_v2 = vld [vmem:[%s1799_s1 + $0x70] sm:$0xff]  ;;  %v721_v13 = vld [vmem:[%s1799_s1 + $0x100] sm:$0xff]  ;;  %vm817_vm11 = vcmask 523264   ;;  %vm819_vm12 = vcmask 785408   ;;  %vm824_vm13 = vcmask 1040384   ;;  %s168_s9 = scalar_lea.vmem %s1801_s3, %s1110_s6 }
  0x13   : > { %1204 = vmatpush3.msra.mxu0 %v174_v4  ;;  %vm343_vm4 = vcmp.lt.s32.totalorder %v1514_v25, %v342_v27  ;;  %1238 = vmatpush3.msra.mxu1 %v518_v43  ;;  %v714_v24 = vld [vmem:[%s1799_s1 + $0xc8] sm:$0xff]  ;;  %v713_v26 = vld [vmem:[%s1799_s1 + $0xc0] sm:$0xff]  ;;  %v712_v27 = vld [vmem:[%s1799_s1 + $0xb8] sm:$0xff]  ;;  %vm1015_vm14 = vcmp.lt.s32.totalorder %v1495_v14, 1  ;;  %vm1019_vm15 = vcmp.ge.s32.totalorder %v1514_v25, 32 }
  0x14   : > { %1205 = vmatprep.subr.mxu0 %v1397_v1  ;;  %vm344_vm5 = vmand %vm340_vm3, %vm343_vm4  ;;  %1239 = vmatprep.subr.mxu1 %v1397_v1  ;;  %v711_v28 = vld [vmem:[%s1799_s1 + $0xb0] sm:$0xff] }
  0x15   : > { %1206 = vmatpush3.msra.mxu0 %v173_v5  ;;  %vm347_vm7 = vmand %vm344_vm5, %vm346_vm6  ;;  %1240 = vmatpush3.msra.mxu1 %v517_v48 }
  0x16   : > { %1207 = vmatprep.subr.mxu0 %v1397_v1  ;;  %v348_v31 = vsel %vm347_vm7, 0.0, %v1400_v30  ;;  %1255 = vmatprep.subr.mxu1 %v1397_v1  ;;  %v709_v30 = vld [vmem:[%s1799_s1 + $0xa0] sm:$0xff] }
  0x17   : > { %1208 = vmatpush3.msra.mxu0 %v172_v6  ;;  %v613_v6 = vrot.slane %v1503_v18, 3 }
  0x18   : > { %1210 = vmatmul.mubr.msk.f32.vlgmr.msra.gmra.mxu0 %vm178_vm1, %v171_v7  ;;  %1212 = vmatprep.subr.mxu0 %v1397_v1  ;;  %vm1016_vm1 = vcmp.lt.s32.totalorder %v1514_v25, 32 }
  0x19   : > { %1213 = vmatpush3.msra.mxu0 %v256_v8  ;;  %1220 = vmatprep.mubr.msk.f32.mxu0 %vm1398_vm0, %v1397_v1  ;;  %vm1017_vm5 = vmand %vm1015_vm14, %vm1016_vm1 }
  0x1a   : > { %1214 = vmatprep.subr.mxu0 %v1397_v1 }
  0x1b   : > { %1215 = vmatpush3.msra.mxu0 %v255_v9  ;;  %v616_v9 = vrot.slane %v1503_v18, 4 }
  0x1c   : > { %1216 = vmatprep.subr.mxu0 %v1397_v1 }
  0x1d   : > { %1217 = vmatpush3.msra.mxu0 %v254_v10 }
  0x1e   : > { %1218 = vmatprep.subr.mxu0 %v1397_v1 }
  0x1f   : > { %1219 = vmatpush3.msra.mxu0 %v253_v11 }
  0x20   : > { %1221 = vmatmul.mubr.msk.f32.vlgmr.msra.gmra.mxu0 %vm261_vm2, %v1487_v12  ;;  %1223 = vmatprep.subr.mxu0 %v1397_v1 }
  0x21   : > { %1225 = vmatprep.mubr.msk.f32.mxu0 %vm1398_vm0, %v1397_v1 }
  0xd8   : > { %v1497_v15 = vpop.f32.mrf.mxu0 }
  0xda   : > { %v1211_v17 = vpop.f32.mrf.mxu0 }
  0xdb   : > { %v720_v17 = vld [vmem:[%s1799_s1 + $0xf8] sm:$0xff] }
  0xe0   : > { %v331_v20 = vpop.f32.mrf.mxu0 }
  0xe1   : > { %v332_v21 = vadd.f32 %v331_v20, %v260_v19  ;;  %v719_v19 = vld [vmem:[%s1799_s1 + $0xf0] sm:$0xff]  ;;  %v718_v20 = vld [vmem:[%s1799_s1 + $0xe8] sm:$0xff] }
  0xe2   : > { %v1222_v22 = vpop.f32.mrf.mxu0 }
  0xe3   : > { %350 = vrot.lane.b32.xlu0 %v332_v21, %s1399_s15  ;;  %v716_v22 = vld [vmem:[%s1799_s1 + $0xd8] sm:$0xff] }
 0x155   : > { %v351_v23 = vpop.permute.xlu0 %350 }
 0x156   : > { %1224 = vmatpush3.xpose.msk.msra.mxu0 %vm261_vm2, %v351_v23  ;;  %v715_v23 = vld [vmem:[%s1799_s1 + $0xd0] sm:$0xff] }
 0x157   : > { %1228 = vmatprep.subr.mxu0 %v1397_v1 }
 0x159   : > { %1226 = vmatmul.mubr.msk.f32.vlgmr.msra.gmra.mxu0 %vm261_vm2, %v332_v21 }
 0x15a   : > { %1230 = vmatprep.mubr.msk.f32.mxu0 %vm1398_vm0, %v1397_v1 }
 0x219   : > { %v422_v29 = vpop.f32.mrf.mxu0 }
 0x21a   : > { %v426_v32 = vmul.f32 0.17677669, %v422_v29  ;;  %v710_v29 = vld [vmem:[%s1799_s1 + $0xa8] sm:$0xff] }
 0x21b   : > { %v1227_v33 = vpop.f32.mrf.mxu0 }
 0x21c   : > { %v427_v34 = vadd.f32 %v426_v32, %v348_v31  ;;  %v708_v31 = vld [vmem:[%s1799_s1 + $0x98] sm:$0xff]  ;;  %v707_v32 = vld [vmem:[%s1799_s1 + $0x90] sm:$0xff]  ;;  %v623_v33 = vrot.slane %v1503_v18, 5 }
 0x21e   : > { %v429_v35 = vsel %vm428_vm8, %v427_v34, -inf }
 0x21f   : > { %430 = vmax.xlane.f32.xlu0 %v429_v35 }
 0x2a8   : > { %v431_v36 = vpop.xlane.xlu0 %430 }
 0x2a9   : > { %v432_v37 = vsub.f32 %v427_v34, %v431_v36 }
 0x2ab   : > { %v433_v38 = vmul.f32 1.442695, %v432_v37 }
 0x2ad   : > { %1375 = vpow2.f32 %v433_v38 }
 0x2ba   : > { %v1376_v39 = vpop.eup %1375 }
 0x2bb   : > { %v435_v40 = vsel %vm428_vm8, %v1376_v39, 0.0  ;;  %vm1025_vm8 = vcmask 1041408  }
 0x2bc   : > { %436 = vadd.xlane.f32.xlu1 %v435_v40 }
 0x2cd   : > { %440 = vrot.lane.b32.xlu1 %v332_v21, %s1401_s16  ;;  %v717_v21 = vld [vmem:[%s1799_s1 + $0xe0] sm:$0xff] }
 0x345   : > { %v437_v44 = vpop.xlane.xlu1 %436 }
 0x346   : > { %1377 = vrcp.f32 %v437_v44 }
 0x349   : > { %v441_v45 = vpop.permute.xlu1 %440 }
 0x34a   : > { %1229 = vmatpush3.msra.mxu0 %v441_v45 }
 0x34b   : > { %1244 = vmatprep.subr.mxu0 %v1397_v1 }
 0x353   : > { %v1378_v46 = vpop.eup %1377 }
 0x354   : > { %v439_v47 = vmul.f32 %v1378_v46, %v1376_v39  ;;  %v723_v46 = vrot.slane %v1503_v18, 6 }
 0x356   : > { %1231 = vmatmul.mubr.msk.f32.vlgmr.msra.gmra.mxu0 %vm443_vm9, %v439_v47 }
 0x357   : > { %1252 = vmatprep.mubr.msk.f32.mxu0 %vm1398_vm0, %v1397_v1  ;;  %1245 = vmatpush3.msra.mxu0 %v622_v62  ;;  %v836_v62 = vld [vmem:[%s1799_s1 + $0x160] sm:$0xff] }
 0x358   : > { %1246 = vmatprep.subr.mxu0 %v1397_v1 }
 0x359   : > { %1247 = vmatpush3.msra.mxu0 %v621_v63  ;;  %v835_v63 = vld [vmem:[%s1799_s1 + $0x158] sm:$0xff] }
 0x35a   : > { %1248 = vmatprep.subr.mxu0 %v1397_v1 }
 0x35b   : > { %1249 = vmatpush3.msra.mxu0 %v620_v0  ;;  %v834_v0 = vld [vmem:[%s1799_s1 + $0x150] sm:$0xff] }
 0x35c   : > { %1250 = vmatprep.subr.mxu0 %v1397_v1 }
 0x35d   : > { %1251 = vmatpush3.msra.mxu0 %v619_v2  ;;  %v833_v2 = vld [vmem:[%s1799_s1 + $0x148] sm:$0xff] }
 0x35e   : > { %1290 = vmatprep.subr.mxu0 %v1397_v1 }
 0x416   : > { %v513_v49 = vpop.f32.mrf.mxu0 }
 0x417   : > { %1242 = vmatmul.mubr.msk.f32.vlgmr.msra.gmra.mxu1 %vm261_vm2, %v513_v49 }
 0x418   : > { %v1232_v50 = vpop.f32.mrf.mxu0  ;;  %1287 = vmatprep.mubr.msk.f32.mxu1 %vm1398_vm0, %v1397_v1 }
 0x4d7   : > { %v593_v52 = vpop.f32.mrf.mxu1 }
 0x4d8   : > { %v594_v53 = vadd.f32 %v593_v52, %v522_v51 }
 0x4d9   : > { %v1243_v54 = vpop.f32.mrf.mxu1 }
 0x4da   : > { %v597_v55 = vadd.f32 %v594_v53, %v1487_v12  ;;  %v722_v12 = vld [vmem:[%s1799_s1 + $0x108] sm:$0xff] }
 0x4db   : > { %1256 = vmatpush3.msra.mxu1 %v722_v12  ;;  %v826_v12 = vld [vmem:[%s1799_s1 + $0x110] sm:$0xff] }
 0x4dc   : > { %v599_v56 = vsel %vm598_vm10, %v597_v55, 0.0  ;;  %1257 = vmatprep.subr.mxu1 %v1397_v1 }
 0x4dd   : > { %600 = vadd.xlane.f32.xlu1 %v599_v56  ;;  %1258 = vmatpush3.msra.mxu1 %v721_v13  ;;  %v809_v13 = vrot.slane %v1503_v18, 7 }
 0x4de   : > { %1259 = vmatprep.subr.mxu1 %v1397_v1 }
 0x4df   : > { %1260 = vmatpush3.msra.mxu1 %v720_v17 }
 0x4e0   : > { %1261 = vmatprep.subr.mxu1 %v1397_v1 }
 0x4e1   : > { %1262 = vmatpush3.msra.mxu1 %v719_v19 }
 0x4e2   : > { %1263 = vmatprep.subr.mxu1 %v1397_v1 }
 0x4e3   : > { %1264 = vmatpush3.msra.mxu1 %v718_v20  ;;  %v1709_v20 = vld [vmem:[%s1800_s2 + $0x8] sm:$0xff] }
 0x4e4   : > { %1265 = vmatprep.subr.mxu1 %v1397_v1 }
 0x4e5   : > { %1266 = vmatpush3.msra.mxu1 %v717_v21 }
 0x4e6   : > { %1267 = vmatprep.subr.mxu1 %v1397_v1 }
 0x4e7   : > { %1268 = vmatpush3.msra.mxu1 %v716_v22 }
 0x4e8   : > { %1269 = vmatprep.subr.mxu1 %v1397_v1 }
 0x4e9   : > { %1270 = vmatpush3.msra.mxu1 %v715_v23 }
 0x4ea   : > { %1271 = vmatprep.subr.mxu1 %v1397_v1 }
 0x4eb   : > { %1272 = vmatpush3.msra.mxu1 %v714_v24 }
 0x4ec   : > { %1273 = vmatprep.subr.mxu1 %v1397_v1 }
 0x4ed   : > { %1274 = vmatpush3.msra.mxu1 %v713_v26 }
 0x4ee   : > { %1275 = vmatprep.subr.mxu1 %v1397_v1 }
 0x4ef   : > { %1276 = vmatpush3.msra.mxu1 %v712_v27  ;;  %v249_v27 = vadd.f32 %v1497_v15, %v1503_v18  ;;  %v938_v15 = vld [vmem:[%s1799_s1 + $0x1f8] sm:$0xff]  ;;  %v937_v18 = vld [vmem:[%s1799_s1 + $0x1f0] sm:$0xff] }
 0x4f0   : > { %1277 = vmatprep.subr.mxu1 %v1397_v1 }
 0x4f1   : > { %1278 = vmatpush3.msra.mxu1 %v711_v28 }
 0x4f2   : > { %1279 = vmatprep.subr.mxu1 %v1397_v1 }
 0x4f3   : > { %1280 = vmatpush3.msra.mxu1 %v710_v29 }
 0x4f4   : > { %1281 = vmatprep.subr.mxu1 %v1397_v1 }
 0x4f5   : > { %1282 = vmatpush3.msra.mxu1 %v709_v30  ;;  %v940_v30 = vld [vmem:[%s1799_s1 + $0x208] sm:$0xff] }
 0x4f6   : > { %1283 = vmatprep.subr.mxu1 %v1397_v1 }
 0x4f7   : > { %1284 = vmatpush3.msra.mxu1 %v708_v31  ;;  %v939_v31 = vld [vmem:[%s1799_s1 + $0x200] sm:$0xff] }
 0x4f8   : > { %1285 = vmatprep.subr.mxu1 %v1397_v1 }
 0x4f9   : > { %1286 = vmatpush3.msra.mxu1 %v707_v32  ;;  %v936_v32 = vld [vmem:[%s1799_s1 + $0x1e8] sm:$0xff] }
 0x4fa   : > { %1325 = vmatprep.subr.mxu1 %v1397_v1 }
 0x566   : > { %v601_v57 = vpop.xlane.xlu1 %600 }
 0x567   : > { %v603_v58 = vmul.f32 0.03125, %v601_v57  ;;  %v841_v57 = vld [vmem:[%s1799_s1 + $0x188] sm:$0xff] }
 0x569   : > { %v604_v59 = vsub.f32 %v597_v55, %v603_v58  ;;  %v840_v58 = vld [vmem:[%s1799_s1 + $0x180] sm:$0xff] }
 0x56b   : > { %v605_v60 = vmul.f32 %v604_v59, %v604_v59 }
 0x56d   : > { %v606_v61 = vsel %vm598_vm10, %v605_v60, 0.0  ;;  %v838_v60 = vld [vmem:[%s1799_s1 + $0x170] sm:$0xff] }
 0x56e   : > { %607 = vadd.xlane.f32.xlu0 %v606_v61  ;;  %v837_v61 = vld [vmem:[%s1799_s1 + $0x168] sm:$0xff] }
 0x5f7   : > { %v608_v3 = vpop.xlane.xlu0 %607 }
 0x5f8   : > { %v609_v4 = vmul.f32 0.03125, %v608_v3  ;;  %v832_v3 = vld [vmem:[%s1799_s1 + $0x140] sm:$0xff] }
 0x5fa   : > { %v610_v5 = vadd.f32 1e-05, %v609_v4  ;;  %v831_v4 = vld [vmem:[%s1799_s1 + $0x138] sm:$0xff] }
 0x5fc   : > { %1379 = vrsqrt.f32 %v610_v5  ;;  %v830_v5 = vld [vmem:[%s1799_s1 + $0x130] sm:$0xff] }
 0x609   : > { %v1380_v7 = vpop.eup %1379 }
 0x60a   : > { %v612_v8 = vmul.f32 %v1380_v7, %v604_v59  ;;  %v839_v59 = vld [vmem:[%s1799_s1 + $0x178] sm:$0xff] }
 0x60c   : > { %v615_v10 = vmul.f32 %v613_v6, %v612_v8  ;;  %v829_v6 = vld [vmem:[%s1799_s1 + $0x128] sm:$0xff] }
 0x60e   : > { %v1565_v11 = vadd.f32 %v616_v9, %v615_v10  ;;  %v828_v10 = vld [vmem:[%s1799_s1 + $0x120] sm:$0xff] }
 0x610   : > { %1253 = vmatmul.mubr.msk.f32.vlgmr.msra.gmra.mxu0 %vm261_vm2, %v1565_v11  ;;  %vm1402_vm2 = vmmov 1  }
 0x611   : > { %1322 = vmatprep.mubr.msk.f32.mxu0 %vm1398_vm0, %v1397_v1  ;;  %1291 = vmatpush3.msra.mxu0 %v841_v57  ;;  %vm1018_vm3 = vmxor %vm1015_vm14, %vm1402_vm2 }
 0x612   : > { %1292 = vmatprep.subr.mxu0 %v1397_v1 }
 0x613   : > { %1293 = vmatpush3.msra.mxu0 %v840_v58 }
 0x614   : > { %1294 = vmatprep.subr.mxu0 %v1397_v1 }
 0x615   : > { %1295 = vmatpush3.msra.mxu0 %v839_v59 }
 0x616   : > { %1296 = vmatprep.subr.mxu0 %v1397_v1 }
 0x617   : > { %1297 = vmatpush3.msra.mxu0 %v838_v60 }
 0x618   : > { %1298 = vmatprep.subr.mxu0 %v1397_v1 }
 0x619   : > { %1299 = vmatpush3.msra.mxu0 %v837_v61 }
 0x61a   : > { %1300 = vmatprep.subr.mxu0 %v1397_v1 }
 0x61b   : > { %1301 = vmatpush3.msra.mxu0 %v836_v62 }
 0x61c   : > { %1302 = vmatprep.subr.mxu0 %v1397_v1 }
 0x61d   : > { %1303 = vmatpush3.msra.mxu0 %v835_v63 }
 0x61e   : > { %1304 = vmatprep.subr.mxu0 %v1397_v1 }
 0x61f   : > { %1305 = vmatpush3.msra.mxu0 %v834_v0 }
 0x620   : > { %1306 = vmatprep.subr.mxu0 %v1397_v1 }
 0x621   : > { %1307 = vmatpush3.msra.mxu0 %v833_v2 }
 0x622   : > { %1308 = vmatprep.subr.mxu0 %v1397_v1 }
 0x623   : > { %1309 = vmatpush3.msra.mxu0 %v832_v3 }
 0x624   : > { %1310 = vmatprep.subr.mxu0 %v1397_v1 }
 0x625   : > { %1311 = vmatpush3.msra.mxu0 %v831_v4 }
 0x626   : > { %1312 = vmatprep.subr.mxu0 %v1397_v1 }
 0x627   : > { %1313 = vmatpush3.msra.mxu0 %v830_v5 }
 0x628   : > { %1314 = vmatprep.subr.mxu0 %v1397_v1 }
 0x629   : > { %1315 = vmatpush3.msra.mxu0 %v829_v6 }
 0x62a   : > { %1316 = vmatprep.subr.mxu0 %v1397_v1 }
 0x62b   : > { %1317 = vmatpush3.msra.mxu0 %v828_v10 }
 0x62c   : > { %1318 = vmatprep.subr.mxu0 %v1397_v1 }
 0x6d0   : > { %v694_v34 = vpop.f32.mrf.mxu0 }
 0x6d1   : > { %v695_v35 = vadd.f32 %v694_v34, %v623_v33  ;;  %v935_v33 = vld [vmem:[%s1799_s1 + $0x1e0] sm:$0xff]  ;;  %v934_v34 = vld [vmem:[%s1799_s1 + $0x1d8] sm:$0xff] }
 0x6d2   : > { %v1254_v36 = vpop.f32.mrf.mxu0 }
 0x6d3   : > { %v699_v37 = vmul.f32 0.044715, %v695_v35  ;;  %v698_v43 = vmul.f32 0.5, %v695_v35  ;;  %v932_v36 = vld [vmem:[%s1799_s1 + $0x1c8] sm:$0xff] }
 0x6d5   : > { %v700_v38 = vmul.f32 %v699_v37, %v695_v35  ;;  %v931_v37 = vld [vmem:[%s1799_s1 + $0x1c0] sm:$0xff] }
 0x6d7   : > { %v701_v39 = vmul.f32 %v700_v38, %v695_v35  ;;  %v930_v38 = vld [vmem:[%s1799_s1 + $0x1b8] sm:$0xff] }
 0x6d9   : > { %v702_v40 = vadd.f32 %v701_v39, %v695_v35  ;;  %v933_v35 = vld [vmem:[%s1799_s1 + $0x1d0] sm:$0xff] }
 0x6da   : > { %v929_v39 = vld [vmem:[%s1799_s1 + $0x1b0] sm:$0xff] }
 0x6db   : > { %v703_v41 = vmul.f32 0.7978846, %v702_v40  ;;  %v928_v40 = vld [vmem:[%s1799_s1 + $0x1a8] sm:$0xff] }
 0x6dd   : > { %1381 = vtanh.f32 %v703_v41  ;;  %v927_v41 = vld [vmem:[%s1799_s1 + $0x1a0] sm:$0xff] }
 0x6ea   : > { %v1382_v42 = vpop.eup %1381 }
 0x6eb   : > { %v705_v44 = vadd.f32 1.0, %v1382_v42  ;;  %v926_v42 = vld [vmem:[%s1799_s1 + $0x198] sm:$0xff] }
 0x6ed   : > { %v706_v45 = vmul.f32 %v705_v44, %v698_v43  ;;  %v925_v43 = vld [vmem:[%s1799_s1 + $0x190] sm:$0xff]  ;;  %v845_v44 = vrot.slane %v1709_v20, %v259_v16 }
 0x6ef   : > { %1288 = vmatmul.mubr.f32.vlgmr.msra.gmra.mxu1 %v706_v45 }
 0x6f0   : > { %1357 = vmatprep.mubr.msk.f32.mxu1 %vm1398_vm0, %v1397_v1  ;;  %1326 = vmatpush3.msra.mxu1 %v940_v30  ;;  %vm1020_vm0 = vcmp.lt.s32.totalorder %v1514_v25, 64 }
 0x6f1   : > { %1327 = vmatprep.subr.mxu1 %v1397_v1  ;;  %vm1021_vm4 = vmand %vm1019_vm15, %vm1020_vm0 }
 0x6f2   : > { %1328 = vmatpush3.msra.mxu1 %v939_v31  ;;  %vm1022_vm6 = vmand %vm1018_vm3, %vm1021_vm4 }
 0x6f3   : > { %1329 = vmatprep.subr.mxu1 %v1397_v1  ;;  %vm1023_vm7 = vmor %vm1017_vm5, %vm1022_vm6 }
 0x6f4   : > { %1330 = vmatpush3.msra.mxu1 %v938_v15 }
 0x6f5   : > { %1331 = vmatprep.subr.mxu1 %v1397_v1 }
 0x6f6   : > { %1332 = vmatpush3.msra.mxu1 %v937_v18 }
 0x6f7   : > { %1333 = vmatprep.subr.mxu1 %v1397_v1 }
 0x6f8   : > { %1334 = vmatpush3.msra.mxu1 %v936_v32 }
 0x6f9   : > { %1335 = vmatprep.subr.mxu1 %v1397_v1 }
 0x6fa   : > { %1336 = vmatpush3.msra.mxu1 %v935_v33 }
 0x6fb   : > { %1337 = vmatprep.subr.mxu1 %v1397_v1 }
 0x6fc   : > { %1338 = vmatpush3.msra.mxu1 %v934_v34 }
 0x6fd   : > { %1339 = vmatprep.subr.mxu1 %v1397_v1 }
 0x6fe   : > { %1340 = vmatpush3.msra.mxu1 %v933_v35 }
 0x6ff   : > { %1341 = vmatprep.subr.mxu1 %v1397_v1 }
 0x700   : > { %1342 = vmatpush3.msra.mxu1 %v932_v36 }
 0x701   : > { %1343 = vmatprep.subr.mxu1 %v1397_v1 }
 0x702   : > { %1344 = vmatpush3.msra.mxu1 %v931_v37 }
 0x703   : > { %1345 = vmatprep.subr.mxu1 %v1397_v1 }
 0x704   : > { %1346 = vmatpush3.msra.mxu1 %v930_v38 }
 0x705   : > { %1347 = vmatprep.subr.mxu1 %v1397_v1 }
 0x706   : > { %1348 = vmatpush3.msra.mxu1 %v929_v39 }
 0x707   : > { %1349 = vmatprep.subr.mxu1 %v1397_v1 }
 0x708   : > { %1350 = vmatpush3.msra.mxu1 %v928_v40 }
 0x709   : > { %1351 = vmatprep.subr.mxu1 %v1397_v1 }
 0x70a   : > { %1352 = vmatpush3.msra.mxu1 %v927_v41 }
 0x70b   : > { %1353 = vmatprep.subr.mxu1 %v1397_v1 }
 0x70c   : > { %1354 = vmatpush3.msra.mxu1 %v926_v42 }
 0x70d   : > { %1355 = vmatprep.subr.mxu1 %v1397_v1 }
 0x70e   : > { %1356 = vmatpush3.msra.mxu1 %v925_v43 }
 0x7af   : > { %v791_v47 = vpop.f32.mrf.mxu1 }
 0x7b0   : > { %v792_v48 = vadd.f32 %v791_v47, %v723_v46 }
 0x7b1   : > { %v1289_v49 = vpop.f32.mrf.mxu1 }
 0x7b2   : > { %v795_v50 = vadd.f32 %v792_v48, %v1565_v11  ;;  %v827_v11 = vld [vmem:[%s1799_s1 + $0x118] sm:$0xff] }
 0x7b3   : > { %1319 = vmatpush3.msra.mxu0 %v827_v11 }
 0x7b4   : > { %v796_v51 = vsel %vm598_vm10, %v795_v50, 0.0  ;;  %1320 = vmatprep.subr.mxu0 %v1397_v1  ;;  %v943_v1 = vsub.s32 2, %v1495_v14 }
 0x7b5   : > { %797 = vadd.xlane.f32.xlu0 %v796_v51  ;;  %1321 = vmatpush3.msra.mxu0 %v826_v12 }
 0x7b6   : > { %v944_v16 = vrot.slane %v1709_v20, %v943_v1 }
 0x83e   : > { %v798_v52 = vpop.xlane.xlu0 %797 }
 0x83f   : > { %v799_v53 = vmul.f32 0.03125, %v798_v52 }
 0x841   : > { %v800_v54 = vsub.f32 %v795_v50, %v799_v53 }
 0x843   : > { %v801_v55 = vmul.f32 %v800_v54, %v800_v54 }
 0x845   : > { %v802_v56 = vsel %vm598_vm10, %v801_v55, 0.0 }
 0x846   : > { %803 = vadd.xlane.f32.xlu0 %v802_v56 }
 0x8cf   : > { %v804_v7 = vpop.xlane.xlu0 %803 }
 0x8d0   : > { %v805_v8 = vmul.f32 0.03125, %v804_v7  ;;  %v1042_v7 = vsub.s32 3, %v1495_v14 }
 0x8d2   : > { %v806_v9 = vadd.f32 1e-05, %v805_v8  ;;  %v1047_v8 = vsub.s32 4, %v1495_v14 }
 0x8d4   : > { %1383 = vrsqrt.f32 %v806_v9  ;;  %v1043_v9 = vrot.slane %v1709_v20, %v1042_v7  ;;  %v1048_v11 = vrot.slane %v1709_v20, %v1047_v8 }
 0x8e1   : > { %v1384_v17 = vpop.eup %1383 }
 0x8e2   : > { %v808_v19 = vmul.f32 %v1384_v17, %v800_v54 }
 0x8e4   : > { %v811_v21 = vmul.f32 %v809_v13, %v808_v19 }
 0x8e6   : > { %v812_v22 = vadd.f32 %v811_v21, %v1709_v20 }
 0x8e8   : > { %814 = vrot.lane.b32.xlu0 %v812_v22, %s1401_s16 }
 0x95a   : > { %v815_v23 = vpop.permute.xlu0 %814 }
 0x95b   : > { %v818_v24 = vsel %vm817_vm11, 0.0, %v815_v23 }
 0x95c   : > { %v820_v26 = vsel %vm819_vm12, %v818_v24, 0.0 }
 0x95d   : > { %v822_v28 = vrot.slane %v820_v26, 7 }
 0x95f   : > { %v825_v29 = vsel %vm824_vm13, %v249_v27, %v822_v28 }
 0x960   : > { %1323 = vmatmul.mubr.f32.vlgmr.msra.gmra.mxu0 %v825_v29 }
 0xa20   : > { %v912_v45 = vpop.f32.mrf.mxu0 }
 0xa21   : > { %v913_v46 = vadd.f32 %v912_v45, %v845_v44 }
 0xa22   : > { %v1324_v47 = vpop.f32.mrf.mxu0 }
 0xa23   : > { %v917_v48 = vmul.f32 0.044715, %v913_v46  ;;  %v916_v54 = vmul.f32 0.5, %v913_v46 }
 0xa25   : > { %v918_v49 = vmul.f32 %v917_v48, %v913_v46 }
 0xa27   : > { %v919_v50 = vmul.f32 %v918_v49, %v913_v46 }
 0xa29   : > { %v920_v51 = vadd.f32 %v919_v50, %v913_v46 }
 0xa2b   : > { %v921_v52 = vmul.f32 0.7978846, %v920_v51 }
 0xa2d   : > { %1385 = vtanh.f32 %v921_v52 }
 0xa3a   : > { %v1386_v53 = vpop.eup %1385 }
 0xa3b   : > { %v923_v55 = vadd.f32 1.0, %v1386_v53 }
 0xa3d   : > { %v924_v56 = vmul.f32 %v923_v55, %v916_v54 }
 0xa3f   : > { %1358 = vmatmul.mubr.f32.vlgmr.msra.gmra.mxu1 %v924_v56 }
 0xaff   : > { %v1011_v57 = vpop.f32.mrf.mxu1 }
 0xb00   : > { %v1012_v58 = vadd.f32 %v1011_v57, %v944_v16 }
 0xb01   : > { %v1359_v59 = vpop.f32.mrf.mxu1 }
 0xb02   : > { %v1024_v60 = vsel %vm1023_vm7, %v1012_v58, 0.0 }
 0xb03   : > { %v1026_v61 = vsel %vm1025_vm8, %v1024_v60, 0.0 }
 0xb04   : > { %1027 = vadd.xlane.f32.xlu1 %v1026_v61 }
 0xb8d   : > { %v1028_v62 = vpop.xlane.xlu1 %1027 }
 0xb8e   : > { %v1029_v63 = vmul.f32 0.03125, %v1028_v62 }
 0xb90   : > { %v1030_v0 = vsub.f32 %v1012_v58, %v1029_v63 }
 0xb92   : > { %v1031_v25 = vsel %vm1023_vm7, %v1030_v0, 0.0 }
 0xb93   : > { %v1032_v2 = vmul.f32 %v1031_v25, %v1031_v25 }
 0xb95   : > { %v1033_v3 = vsel %vm1025_vm8, %v1032_v2, 0.0 }
 0xb96   : > { %1034 = vadd.xlane.f32.xlu1 %v1033_v3 }
 0xc1f   : > { %v1035_v4 = vpop.xlane.xlu1 %1034 }
 0xc20   : > { %v1036_v5 = vmul.f32 0.03125, %v1035_v4 }
 0xc22   : > { %v1037_v6 = vadd.f32 1e-05, %v1036_v5 }
 0xc24   : > { %1387 = vrsqrt.f32 %v1037_v6 }
 0xc31   : > { %v1388_v10 = vpop.eup %1387 }
 0xc32   : > { %v1039_v12 = vmul.f32 %v1388_v10, %v1031_v25 }
 0xc34   : > { %v1044_v13 = vmul.f32 %v1043_v9, %v1039_v12 }
 0xc36   : > { %v1049_v17 = vadd.f32 %v1048_v11, %v1044_v13 }
 0xc38   : > { %1050 = vst [vmem:[%s168_s9] sm:$0x3] %v1049_v17 }
 0xc39 PF: > { %s13_s12 = sadd.s32 1, %s1395_s12  }
 0xc3a   : > { %p10_p4 = scmp.ge.s32.totalorder %s13_s12, 4  }
 0xc3c   :  { %12 = sbr.rel (!%p10_p4) target bundleno = 1 (0x1), region = 62 }

</bundles_post_ra>
